<compile_context>
chip_gen: v6e
topology: v6e:2x2x1
jax: 0.10.0
libtpu: 0.0.40
codegen_flags: <defaults>
</compile_context>

<pallas_src>
import functools

import jax
import jax.numpy as jnp
from jax import lax
from jax.experimental import pallas as pl
from jax.experimental.pallas import tpu as pltpu

LANE = 128  # TPU lane width.


def _dwconv_kernel(x_ref, w_ref, b_ref, o_ref):
    """One (batch, channel-tile, row-tile) grid step of the depthwise 3x3 conv.

    x_ref: (H, W, Ct)  unpadded image of this (batch, channel tile); VMEM resident
    w_ref: (3, 3, Ct)  depthwise taps, channels-last
    b_ref: (1, 1, Ct)  bias
    o_ref: (TH, W, Ct) output row tile
    """
    th, w_out, ct = o_ref.shape
    h_full = x_ref.shape[0]
    t = pl.program_id(2)
    r0 = pl.multiple_of(t * th, th)          # first output row of this tile

    # Hoisted loop invariants: taps, bias, W-edge masks.
    w_all = w_ref[...].astype(jnp.float32)                             # (3, 3, Ct)
    taps = [[w_all[kh, kw].reshape(1, ct) for kw in range(3)] for kh in range(3)]
    bias = b_ref[0].astype(jnp.float32)                                # (1, Ct)
    w_iota = lax.broadcasted_iota(jnp.int32, (w_out, 1), 0)
    mask_l = (w_iota > 0).astype(jnp.float32)          # zero contribution at w == 0
    mask_r = (w_iota < w_out - 1).astype(jnp.float32)  # zero contribution at w == W-1

    def load_row(h):
        """Row h of the (conceptually zero-padded) image, upcast per-row to f32."""
        hc = jnp.clip(h, 0, h_full - 1)
        row = x_ref[hc].astype(jnp.float32)                            # (W, Ct)
        valid = jnp.logical_and(h >= 0, h < h_full)
        return jnp.where(valid, row, 0.0)

    def body(i, carry):
        row_m1, row_0 = carry                 # input rows r0+i-1, r0+i (f32)
        row_p1 = load_row(r0 + i + 1)         # rolling window: one new row per output row
        # Combine the three kh taps per kw first (roll is linear), so each W
        # shift is a single XLU roll instead of three.
        center = row_m1 * taps[0][1] + row_0 * taps[1][1] + row_p1 * taps[2][1]
        left = row_m1 * taps[0][0] + row_0 * taps[1][0] + row_p1 * taps[2][0]
        right = row_m1 * taps[0][2] + row_0 * taps[1][2] + row_p1 * taps[2][2]
        out = (center
               + mask_l * pltpu.roll(left, 1, axis=0)            # x[.., w-1] taps
               + mask_r * pltpu.roll(right, w_out - 1, axis=0)   # x[.., w+1] taps
               + bias)
        o_ref[i] = out.astype(o_ref.dtype)
        return (row_0, row_p1)

    lax.fori_loop(0, th, body, (load_row(r0 - 1), load_row(r0)))


def _largest_divisor_leq(n, cap):
    cap = max(1, min(cap, n))
    for d in range(cap, 0, -1):
        if n % d == 0:
            return d
    return 1


def dwconv_pallas(x, weight, bias, H, W, *, target_tile_bytes=1 << 20):
    """Depthwise 3x3 conv (stride 1, pad 1, groups=C) + bias, fused in one kernel.

    Contract: x is (B, N, C) with N == H*W and a row-major (H, W) flattening of
    the tokens (exactly what the PyTorch DWConv block produces).
    weight: (C, 3, 3) (PyTorch (C, 1, 3, 3) squeezed); bias: (C,).
    Returns (B, N, C).
    """
    B, N, C = x.shape
    assert N == H * W, (N, H, W)
    itemsize = jnp.dtype(x.dtype).itemsize

    # Channel tiling: lane-dense 128-wide tiles when possible.  Otherwise the
    # full channel dim is one block (kept at its real width: no pad / no slice).
    if C % LANE == 0:
        ct = LANE
    else:
        ct = C
        # TODO(synk): for tiny C (< 128) a W-into-lanes fold would make stores
        # lane-dense; skipped since it only matters if small-C shapes dominate.
    n_ct = C // ct

    # Row tile: big enough that one output block is ~target_tile_bytes and an
    # exact divisor of H (no ragged last tile); guarantee >= 2 grid steps so
    # both v7x TensorCores get work even when B == 1 and n_ct == 1.
    max_rows = max(1, target_tile_bytes // max(1, W * ct * itemsize))
    th = _largest_divisor_leq(H, max_rows)
    if B * n_ct * (H // th) < 2 and H >= 2:
        th = _largest_divisor_leq(H, H // 2)
    n_t = H // th

    xi = x.reshape(B, H, W, C)             # (B, N, C) is already NHWC: free reshape, no pad
    wk = jnp.transpose(weight, (1, 2, 0))  # (3, 3, C) channels-last (tiny)
    bk = bias.reshape(1, 1, C)

    grid = (B, n_ct, n_t)                  # row tiles innermost -> image stays VMEM-resident

    flops = 2 * 9 * B * H * W * C
    bytes_accessed = (xi.size + wk.size + bk.size + B * H * W * C) * itemsize

    cp_kwargs = dict(dimension_semantics=("parallel", "parallel", "parallel"))
    # Scoped-VMEM override only when the resident image + double-buffered
    # blocks exceed the 16 MiB v5e default (keeps headroom on v7x's 64 MiB).
    est_vmem = 2 * (H * W * ct + th * W * ct + 12 * ct) * itemsize + (1 << 20)
    if est_vmem > (16 << 20):
        cp_kwargs["vmem_limit_bytes"] = min(int(1.5 * est_vmem), 64 << 20)

    out = pl.pallas_call(
        _dwconv_kernel,
        out_shape=jax.ShapeDtypeStruct((B, H, W, C), x.dtype),
        grid=grid,
        in_specs=[
            # Whole (unpadded) image of this (batch, channel tile).  Block index
            # ignores the row-tile axis, so it is DMA'd once per (b, c) and kept
            # resident while the row tiles stream out.
            pl.BlockSpec((None, H, W, ct), lambda b, c, t: (b, 0, 0, c)),
            pl.BlockSpec((3, 3, ct), lambda b, c, t: (0, 0, c)),
            pl.BlockSpec((1, 1, ct), lambda b, c, t: (0, 0, c)),
        ],
        out_specs=pl.BlockSpec((None, th, W, ct), lambda b, c, t: (b, t, 0, c)),
        compiler_params=pltpu.CompilerParams(**cp_kwargs),
        cost_estimate=pl.CostEstimate(
            flops=flops, transcendentals=0, bytes_accessed=bytes_accessed),
    )(xi, wk, bk)

    return out.reshape(B, N, C)


def dwconv_ref(x, weight, bias, H, W):
    """Pure-jnp reference (same math)."""
    B, N, C = x.shape
    xi = x.reshape(B, H, W, C).astype(jnp.float32)
    xpad = jnp.pad(xi, ((0, 0), (1, 1), (1, 1), (0, 0)))
    out = jnp.zeros((B, H, W, C), jnp.float32)
    for kh in range(3):
        for kw in range(3):
            out = out + xpad[:, kh:kh + H, kw:kw + W, :] * \
                weight[:, kh, kw][None, None, None, :]
    out = out + bias[None, None, None, :]
    return out.reshape(B, N, C).astype(x.dtype)


if __name__ == "__main__":
    key = jax.random.PRNGKey(0)
    B, C, H, W = 2, 64, 16, 16          # small DWConv: dim=64, 16x16 tokens
    N = H * W

    kx, kw_, kb = jax.random.split(key, 3)
    x = jax.random.normal(kx, (B, N, C), dtype=jnp.float32)
    # PyTorch depthwise Conv2d weight is (C, 1, 3, 3); stored here as (C, 3, 3).
    weight = 0.1 * jax.random.normal(kw_, (C, 3, 3), dtype=jnp.float32)
    bias = 0.1 * jax.random.normal(kb, (C,), dtype=jnp.float32)

    fn = jax.jit(functools.partial(dwconv_pallas, H=H, W=W))
    out = jax.block_until_ready(fn(x, weight, bias))
    assert out.shape == (B, N, C), out.shape

    ref = jax.block_until_ready(dwconv_ref(x, weight, bias, H, W))
    err = float(jnp.max(jnp.abs(out - ref)))
    assert err < 1e-4, f"max abs err {err}"

    print("KERNEL_OK")
</pallas_src>

<mosaic_0001>
module attributes {stable_mosaic.version = 11 : i64} {
  func.func @_dwconv_kernel(%arg0: i32, %arg1: i32, %arg2: i32, %arg3: memref<1x16x16x64xf32, #tpu.memory_space<vmem>>, %arg4: memref<3x3x64xf32, #tpu.memory_space<vmem>>, %arg5: memref<1x1x64xf32, #tpu.memory_space<vmem>>, %arg6: memref<1x16x16x64xf32, #tpu.memory_space<vmem>>) attributes {dimension_semantics = [#tpu.dimension_semantics<parallel>, #tpu.dimension_semantics<parallel>, #tpu.dimension_semantics<parallel>], iteration_bounds = array<i64: 2, 1, 1>, scalar_prefetch = 0 : i64, scratch_operands = 0 : i64, tpu.core_type = #tpu.core_type<tc>, window_params = [{transform_indices = @transform_0, window_bounds = array<i64: 1, 16, 16, 64>}, {transform_indices = @transform_1, window_bounds = array<i64: 3, 3, 64>}, {transform_indices = @transform_2, window_bounds = array<i64: 1, 1, 64>}, {transform_indices = @transform_3, window_bounds = array<i64: 1, 16, 16, 64>}]} {
    %c16_i32 = arith.constant 16 : i32
    %0 = arith.muli %arg2, %c16_i32 : i32
    %1 = tpu.assume_multiple %0, 16 : i32
    %c0 = arith.constant 0 : index
    %c0_0 = arith.constant 0 : index
    %c0_1 = arith.constant 0 : index
    %2 = vector.load %arg4[%c0, %c0_0, %c0_1] : memref<3x3x64xf32, #tpu.memory_space<vmem>>, vector<3x3x64xf32>
    %3 = vector.extract_strided_slice %2 {offsets = [0, 0, 0], sizes = [1, 1, 64], strides = [1, 1, 1]} : vector<3x3x64xf32> to vector<1x1x64xf32>
    %4 = vector.shape_cast %3 : vector<1x1x64xf32> to vector<64xf32>
    %5 = vector.shape_cast %4 : vector<64xf32> to vector<1x64xf32>
    %6 = vector.extract_strided_slice %2 {offsets = [0, 1, 0], sizes = [1, 1, 64], strides = [1, 1, 1]} : vector<3x3x64xf32> to vector<1x1x64xf32>
    %7 = vector.shape_cast %6 : vector<1x1x64xf32> to vector<64xf32>
    %8 = vector.shape_cast %7 : vector<64xf32> to vector<1x64xf32>
    %9 = vector.extract_strided_slice %2 {offsets = [0, 2, 0], sizes = [1, 1, 64], strides = [1, 1, 1]} : vector<3x3x64xf32> to vector<1x1x64xf32>
    %10 = vector.shape_cast %9 : vector<1x1x64xf32> to vector<64xf32>
    %11 = vector.shape_cast %10 : vector<64xf32> to vector<1x64xf32>
    %12 = vector.extract_strided_slice %2 {offsets = [1, 0, 0], sizes = [1, 1, 64], strides = [1, 1, 1]} : vector<3x3x64xf32> to vector<1x1x64xf32>
    %13 = vector.shape_cast %12 : vector<1x1x64xf32> to vector<64xf32>
    %14 = vector.shape_cast %13 : vector<64xf32> to vector<1x64xf32>
    %15 = vector.extract_strided_slice %2 {offsets = [1, 1, 0], sizes = [1, 1, 64], strides = [1, 1, 1]} : vector<3x3x64xf32> to vector<1x1x64xf32>
    %16 = vector.shape_cast %15 : vector<1x1x64xf32> to vector<64xf32>
    %17 = vector.shape_cast %16 : vector<64xf32> to vector<1x64xf32>
    %18 = vector.extract_strided_slice %2 {offsets = [1, 2, 0], sizes = [1, 1, 64], strides = [1, 1, 1]} : vector<3x3x64xf32> to vector<1x1x64xf32>
    %19 = vector.shape_cast %18 : vector<1x1x64xf32> to vector<64xf32>
    %20 = vector.shape_cast %19 : vector<64xf32> to vector<1x64xf32>
    %21 = vector.extract_strided_slice %2 {offsets = [2, 0, 0], sizes = [1, 1, 64], strides = [1, 1, 1]} : vector<3x3x64xf32> to vector<1x1x64xf32>
    %22 = vector.shape_cast %21 : vector<1x1x64xf32> to vector<64xf32>
    %23 = vector.shape_cast %22 : vector<64xf32> to vector<1x64xf32>
    %24 = vector.extract_strided_slice %2 {offsets = [2, 1, 0], sizes = [1, 1, 64], strides = [1, 1, 1]} : vector<3x3x64xf32> to vector<1x1x64xf32>
    %25 = vector.shape_cast %24 : vector<1x1x64xf32> to vector<64xf32>
    %26 = vector.shape_cast %25 : vector<64xf32> to vector<1x64xf32>
    %27 = vector.extract_strided_slice %2 {offsets = [2, 2, 0], sizes = [1, 1, 64], strides = [1, 1, 1]} : vector<3x3x64xf32> to vector<1x1x64xf32>
    %28 = vector.shape_cast %27 : vector<1x1x64xf32> to vector<64xf32>
    %29 = vector.shape_cast %28 : vector<64xf32> to vector<1x64xf32>
    %c0_2 = arith.constant 0 : index
    %c0_3 = arith.constant 0 : index
    %c0_4 = arith.constant 0 : index
    %30 = vector.load %arg5[%c0_2, %c0_3, %c0_4] : memref<1x1x64xf32, #tpu.memory_space<vmem>>, vector<1x1x64xf32>
    %31 = vector.shape_cast %30 : vector<1x1x64xf32> to vector<1x64xf32>
    %32 = tpu.iota {dimensions = array<i32: 0>} : vector<16x1xi32>
    %c0_i32 = arith.constant 0 : i32
    %33 = vector.broadcast %c0_i32 : i32 to vector<16x1xi32>
    %34 = arith.cmpi sgt, %32, %33 : vector<16x1xi32>
    %35 = arith.extui %34 : vector<16x1xi1> to vector<16x1xi32>
    %36 = arith.sitofp %35 : vector<16x1xi32> to vector<16x1xf32>
    %c15_i32 = arith.constant 15 : i32
    %37 = vector.broadcast %c15_i32 : i32 to vector<16x1xi32>
    %38 = arith.cmpi slt, %32, %37 : vector<16x1xi32>
    %39 = arith.extui %38 : vector<16x1xi1> to vector<16x1xi32>
    %40 = arith.sitofp %39 : vector<16x1xi32> to vector<16x1xf32>
    %c1_i32 = arith.constant 1 : i32
    %41 = arith.subi %1, %c1_i32 : i32
    %c0_i32_5 = arith.constant 0 : i32
    %c15_i32_6 = arith.constant 15 : i32
    %42 = arith.maxsi %c0_i32_5, %41 : i32
    %43 = arith.minsi %c15_i32_6, %42 : i32
    %c0_7 = arith.constant 0 : index
    %44 = arith.index_cast %43 : i32 to index
    %c0_8 = arith.constant 0 : index
    %c0_9 = arith.constant 0 : index
    %45 = vector.load %arg3[%c0_7, %44, %c0_8, %c0_9] : memref<1x16x16x64xf32, #tpu.memory_space<vmem>>, vector<1x1x16x64xf32>
    %46 = vector.shape_cast %45 : vector<1x1x16x64xf32> to vector<16x64xf32>
    %c0_i32_10 = arith.constant 0 : i32
    %47 = arith.cmpi sge, %41, %c0_i32_10 : i32
    %c16_i32_11 = arith.constant 16 : i32
    %48 = arith.cmpi slt, %41, %c16_i32_11 : i32
    %49 = arith.andi %47, %48 : i1
    %cst = arith.constant 0.000000e+00 : f32
    %50 = vector.broadcast %cst : f32 to vector<16x64xf32>
    %51 = arith.select %49, %46, %50 : vector<16x64xf32>
    %c0_i32_12 = arith.constant 0 : i32
    %c15_i32_13 = arith.constant 15 : i32
    %52 = arith.maxsi %c0_i32_12, %1 : i32
    %53 = arith.minsi %c15_i32_13, %52 : i32
    %c0_14 = arith.constant 0 : index
    %54 = arith.index_cast %53 : i32 to index
    %c0_15 = arith.constant 0 : index
    %c0_16 = arith.constant 0 : index
    %55 = vector.load %arg3[%c0_14, %54, %c0_15, %c0_16] : memref<1x16x16x64xf32, #tpu.memory_space<vmem>>, vector<1x1x16x64xf32>
    %56 = vector.shape_cast %55 : vector<1x1x16x64xf32> to vector<16x64xf32>
    %c0_i32_17 = arith.constant 0 : i32
    %57 = arith.cmpi sge, %1, %c0_i32_17 : i32
    %c16_i32_18 = arith.constant 16 : i32
    %58 = arith.cmpi slt, %1, %c16_i32_18 : i32
    %59 = arith.andi %57, %58 : i1
    %cst_19 = arith.constant 0.000000e+00 : f32
    %60 = vector.broadcast %cst_19 : f32 to vector<16x64xf32>
    %61 = arith.select %59, %56, %60 : vector<16x64xf32>
    %c0_i32_20 = arith.constant 0 : i32
    %c16_i32_21 = arith.constant 16 : i32
    %62 = arith.addi %c0_i32_20, %c16_i32_21 : i32
    %c1_i32_22 = arith.constant 1 : i32
    %63:2 = scf.for %arg7 = %c0_i32_20 to %62 step %c1_i32_22 iter_args(%arg8 = %51, %arg9 = %61) -> (vector<16x64xf32>, vector<16x64xf32>)  : i32 {
      %64 = arith.addi %1, %arg7 : i32
      %c1_i32_24 = arith.constant 1 : i32
      %65 = arith.addi %64, %c1_i32_24 : i32
      %c0_i32_25 = arith.constant 0 : i32
      %c15_i32_26 = arith.constant 15 : i32
      %66 = arith.maxsi %c0_i32_25, %65 : i32
      %67 = arith.minsi %c15_i32_26, %66 : i32
      %c0_27 = arith.constant 0 : index
      %68 = arith.index_cast %67 : i32 to index
      %c0_28 = arith.constant 0 : index
      %c0_29 = arith.constant 0 : index
      %69 = vector.load %arg3[%c0_27, %68, %c0_28, %c0_29] : memref<1x16x16x64xf32, #tpu.memory_space<vmem>>, vector<1x1x16x64xf32>
      %70 = vector.shape_cast %69 : vector<1x1x16x64xf32> to vector<16x64xf32>
      %c0_i32_30 = arith.constant 0 : i32
      %71 = arith.cmpi sge, %65, %c0_i32_30 : i32
      %c16_i32_31 = arith.constant 16 : i32
      %72 = arith.cmpi slt, %65, %c16_i32_31 : i32
      %73 = arith.andi %71, %72 : i1
      %cst_32 = arith.constant 0.000000e+00 : f32
      %74 = vector.broadcast %cst_32 : f32 to vector<16x64xf32>
      %75 = arith.select %73, %70, %74 : vector<16x64xf32>
      %76 = vector.broadcast %8 : vector<1x64xf32> to vector<16x64xf32>
      %77 = arith.mulf %arg8, %76 : vector<16x64xf32>
      %78 = vector.broadcast %17 : vector<1x64xf32> to vector<16x64xf32>
      %79 = arith.mulf %arg9, %78 : vector<16x64xf32>
      %80 = arith.addf %77, %79 : vector<16x64xf32>
      %81 = vector.broadcast %26 : vector<1x64xf32> to vector<16x64xf32>
      %82 = arith.mulf %75, %81 : vector<16x64xf32>
      %83 = arith.addf %80, %82 : vector<16x64xf32>
      %84 = vector.broadcast %5 : vector<1x64xf32> to vector<16x64xf32>
      %85 = arith.mulf %arg8, %84 : vector<16x64xf32>
      %86 = vector.broadcast %14 : vector<1x64xf32> to vector<16x64xf32>
      %87 = arith.mulf %arg9, %86 : vector<16x64xf32>
      %88 = arith.addf %85, %87 : vector<16x64xf32>
      %89 = vector.broadcast %23 : vector<1x64xf32> to vector<16x64xf32>
      %90 = arith.mulf %75, %89 : vector<16x64xf32>
      %91 = arith.addf %88, %90 : vector<16x64xf32>
      %92 = vector.broadcast %11 : vector<1x64xf32> to vector<16x64xf32>
      %93 = arith.mulf %arg8, %92 : vector<16x64xf32>
      %94 = vector.broadcast %20 : vector<1x64xf32> to vector<16x64xf32>
      %95 = arith.mulf %arg9, %94 : vector<16x64xf32>
      %96 = arith.addf %93, %95 : vector<16x64xf32>
      %97 = vector.broadcast %29 : vector<1x64xf32> to vector<16x64xf32>
      %98 = arith.mulf %75, %97 : vector<16x64xf32>
      %99 = arith.addf %96, %98 : vector<16x64xf32>
      %c1_i32_33 = arith.constant 1 : i32
      %100 = tpu.dynamic_rotate %91 by %c1_i32_33 dim 0 : vector<16x64xf32>, i32 -> vector<16x64xf32>
      %101 = vector.broadcast %36 : vector<16x1xf32> to vector<16x64xf32>
      %102 = arith.mulf %101, %100 : vector<16x64xf32>
      %103 = arith.addf %83, %102 : vector<16x64xf32>
      %c15_i32_34 = arith.constant 15 : i32
      %104 = tpu.dynamic_rotate %99 by %c15_i32_34 dim 0 : vector<16x64xf32>, i32 -> vector<16x64xf32>
      %105 = vector.broadcast %40 : vector<16x1xf32> to vector<16x64xf32>
      %106 = arith.mulf %105, %104 : vector<16x64xf32>
      %107 = arith.addf %103, %106 : vector<16x64xf32>
      %108 = vector.broadcast %31 : vector<1x64xf32> to vector<16x64xf32>
      %109 = arith.addf %107, %108 : vector<16x64xf32>
      %c0_35 = arith.constant 0 : index
      %110 = arith.index_cast %arg7 : i32 to index
      %c0_36 = arith.constant 0 : index
      %c0_37 = arith.constant 0 : index
      %111 = vector.load %arg6[%c0_35, %110, %c0_36, %c0_37] : memref<1x16x16x64xf32, #tpu.memory_space<vmem>>, vector<1x1x16x64xf32>
      %112 = vector.shape_cast %111 : vector<1x1x16x64xf32> to vector<16x64xf32>
      %113 = vector.shape_cast %109 : vector<16x64xf32> to vector<1x1x16x64xf32>
      tpu.vector_store %arg6[%c0_35, %110, %c0_36, %c0_37], %113 {strides = array<i32>} : memref<1x16x16x64xf32, #tpu.memory_space<vmem>>, vector<1x1x16x64xf32>,
      scf.yield %arg9, %75 : vector<16x64xf32>, vector<16x64xf32>
    }
    %c16_i32_23 = arith.constant 16 : i32
    return
  }
  func.func @transform_0(%arg0: i32, %arg1: i32, %arg2: i32) -> (i32, i32, i32, i32) {
    %c0_i32 = arith.constant 0 : i32
    %c0_i32_0 = arith.constant 0 : i32
    %c0_i32_1 = arith.constant 0 : i32
    return %arg0, %c0_i32, %c0_i32_0, %arg1 : i32, i32, i32, i32
  }
  func.func @transform_1(%arg0: i32, %arg1: i32, %arg2: i32) -> (i32, i32, i32) {
    %c0_i32 = arith.constant 0 : i32
    %c0_i32_0 = arith.constant 0 : i32
    %c0_i32_1 = arith.constant 0 : i32
    return %c0_i32, %c0_i32_0, %arg1 : i32, i32, i32
  }
  func.func @transform_2(%arg0: i32, %arg1: i32, %arg2: i32) -> (i32, i32, i32) {
    %c0_i32 = arith.constant 0 : i32
    %c0_i32_0 = arith.constant 0 : i32
    %c0_i32_1 = arith.constant 0 : i32
    return %c0_i32, %c0_i32_0, %arg1 : i32, i32, i32
  }
  func.func @transform_3(%arg0: i32, %arg1: i32, %arg2: i32) -> (i32, i32, i32, i32) {
    %c0_i32 = arith.constant 0 : i32
    %c0_i32_0 = arith.constant 0 : i32
    return %arg0, %arg2, %c0_i32, %arg1 : i32, i32, i32, i32
  }
}

</mosaic_0001>

<bundles_post_ra>
// kernel: dwconv_pallas.1
= control target key start
LH: loop header
LB: loop body
LE: loop exit
PB: predicated region body
PF: predicated region fallthrough
CT: control target
= control target key end

     0   :  { %s776_s12 = smov 0   ;;  %s778_s13 = smov 0   ;;  %s913_s0 = inlined_call_operand.vmem [shape: f32[2,16,16,64], index: 0, kind: input, shape index: {}]   ;;  %s914_s1 = inlined_call_operand.vmem [shape: f32[3,3,64], index: 1, kind: input, shape index: {}]   ;;  %s915_s2 = inlined_call_operand.vmem [shape: f32[1,1,64], index: 2, kind: input, shape index: {}]   ;;  %s916_s3 = inlined_call_operand.vmem [shape: f32[2,16,16,64], index: 3, kind: output, shape index: {}]  }
   0x1   :  { %s780_s14 = smov 0  }
   0x2 LB: > { %s32_s15 = sadd.s32 1, %s729_s13  ;;  %p598_p0 = scmp.ge.s32.totalorder %s733_s14, 1  ;;  %s733_s14 = sphi %s780_s14, %s13_s14   ;;  %s729_s13 = sphi %s778_s13, %s923_s13   ;;  %s725_s12 = sphi %s776_s12, %s922_s12  }
   0x3   : > { %p34_p1 = scmp.ge.s32.totalorder %s32_s15, 2  ;;  %p182_p2 = scmp.lt.s32.totalorder %s733_s14, 3 }
   0x5   : > { %s925_s15 = smov (%p34_p1, %s32_s15), 0  ;;  %p183_p3 = pnand %p598_p0, %p182_p2 }
   0x6   : > { %p224_p4 = scmp.lt.s32.totalorder (!%p183_p3), %s725_s12, 1  ;;  %s842_s4 = smov (!%p183_p3), 0  }
   0x7   : > { %186 = sbr.rel (%p183_p3) target bundleno = 49 (0x31), region = 32 }
   0xc   : > { %v797_v0 = vld [vmem:[%s914_s1] sm:$0x7]  ;;  %v802_v1 = vld [vmem:[%s914_s1 + $0x4] sm:$0x7]  ;;  %v258_v2 = vlaneseq  ;;  %v807_v3 = vld [vmem:[%s914_s1 + $0x8] sm:$0x7] }
   0xd   : > { %v812_v4 = vld [vmem:[%s915_s2] ss:$0 sm:$0xff]  ;;  %s927_s12 = smov (!%p224_p4, %s725_s12), 1  ;;  %v755_v7 = vmov 0.0   ;;  %v838_v12 = vmov 0.0   ;;  %v840_v13 = vmov 0.0  }
   0xe   : > { %v814_v5 = vshrl.u32 %v258_v2, 7  ;;  %s616_s24 = sshll.u32 %s927_s12, 8 }
   0xf   : > { %s821_s27 = scalar_lea.vmem %s913_s0, %s616_s24  ;;  %s826_s30 = scalar_lea.vmem %s916_s3, %s616_s24 }
  0x10   : > { %v260_v6 = vadd.s32 8, %v814_v5  ;;  %vm261_vm0 = vcmp.gt.s32.totalorder %v814_v5, 0  ;;  %v297_v9 = vld [vmem:[%s821_s27] sm:$0xff]   ;;  %v298_v10 = vld [vmem:[%s821_s27 + $0x8] sm:$0xff]  }
  0x11   : > { %v828_v8 = vsel %vm261_vm0, 1.0, %v755_v7 }
  0x12   : > { %vm268_vm1 = vcmp.lt.s32.totalorder %v260_v6, 15 }
  0x13   : > { %v832_v11 = vsel %vm268_vm1, 1.0, %v755_v7 }
  0x14 LB: >> { %v917_v14 = vmov %v737_v10  ;;  %v918_v15 = vmov %v741_v9  ;;  %s856_s5 = sadd.s32 1, %s753_s4   ;;  %v361_v16 = vsub.s32 0, %v814_v5  ;;  %v383_v17 = vsub.s32 2, %v814_v5  ;;  %s613_s11 = sshll.u32 %s753_s4, 4  ;;  %s753_s4 = sphi %s842_s4, %s921_s4   ;;  %v749_v13 = vphi %v840_v13, %v920_v13   ;;  %v745_v12 = vphi %v838_v12, %v919_v12   ;;  %v741_v9 = vphi %v297_v9, %v687_v9   ;;  %v737_v10 = vphi %v298_v10, %v690_v10  }
  0x15   : >> { %p320_p5 = scmp.gt.s32.totalorder %s856_s5, 0  ;;  %p605_p6 = scmp.lt.s32.totalorder %s856_s5, 15  ;;  %v339_v18 = vsub.s32 1, %v814_v5  ;;  %vm405_vm2 = vcmp.lt.s32.totalorder %v814_v5, 1  ;;  %vm414_vm3 = vcmp.lt.s32.totalorder %v814_v5, 7  ;;  %vm431_vm4 = vcmask 523264  }
  0x16   : >> { %p328_p7 = scmp.ge.s32.totalorder %s856_s5, 0  ;;  %p329_p8 = scmp.lt.s32.totalorder %s856_s5, 16  ;;  %v362_v19 = vrot.slane %v797_v0, %v361_v16  ;;  %v368_v20 = vrot.slane %v802_v1, %v361_v16  ;;  %v384_v21 = vrot.slane %v797_v0, %v383_v17  ;;  %v390_v22 = vrot.slane %v802_v1, %v383_v17 }
  0x17   : >> { %s321_s6 = scalar_select %p320_p5, %s856_s5, 0  ;;  %v340_v23 = vrot.slane %v797_v0, %v339_v18  ;;  %v346_v24 = vrot.slane %v802_v1, %v339_v18  ;;  %v376_v26 = vrot.slane %v807_v3, %v361_v16  ;;  %v398_v34 = vrot.slane %v807_v3, %v383_v17 }
  0x18   : >> { %p330_p9 = pnand %p329_p8, %p328_p7  ;;  %v363_v25 = vmul.f32 %v749_v13, %v362_v19  ;;  %v364_v27 = vmul.f32 %v745_v12, %v362_v19  ;;  %v369_v28 = vmul.f32 %v918_v15, %v368_v20  ;;  %v385_v29 = vmul.f32 %v749_v13, %v384_v21  ;;  %s430_s12 = scalar_lea.vmem %s826_s30, %s613_s11 }
  0x19   : >> { %s929_s6 = smov (!%p605_p6, %s321_s6), 15  ;;  %v391_v30 = vmul.f32 %v918_v15, %v390_v22  ;;  %v370_v31 = vmul.f32 %v917_v14, %v368_v20  ;;  %v386_v32 = vmul.f32 %v745_v12, %v384_v21  ;;  %v392_v33 = vmul.f32 %v917_v14, %v390_v22  ;;  %p310_p11 = scmp.ge.s32.totalorder %s856_s5, 16  }
  0x1a   : >> { %s611_s7 = scalar_select %p330_p9, 0, 1  ;;  %v342_v35 = vmul.f32 %v745_v12, %v340_v23  ;;  %v348_v36 = vmul.f32 %v917_v14, %v346_v24  ;;  %v354_v37 = vrot.slane %v807_v3, %v339_v18  ;;  %v341_v38 = vmul.f32 %v749_v13, %v340_v23 }
  0x1b   : >> { %s610_s8 = sshll.u32 %s929_s6, 4  ;;  %v347_v39 = vmul.f32 %v918_v15, %v346_v24  ;;  %v371_v40 = vadd.f32 %v369_v28, %v363_v25  ;;  %v393_v41 = vadd.f32 %v391_v30, %v385_v29  ;;  %v372_v42 = vadd.f32 %v370_v31, %v364_v27  ;;  %s921_s4 = smov %s856_s5 }
  0x1c   : >> { %p685_p10 = scmp.eq.s32.totalorder %s611_s7, 1  ;;  %s325_s9 = scalar_lea.vmem %s821_s27, %s610_s8  ;;  %v394_v43 = vadd.f32 %v392_v33, %v386_v32  ;;  %v350_v46 = vadd.f32 %v348_v36, %v342_v35 }
  0x1d   : >> { %v349_v50 = vadd.f32 %v347_v39, %v341_v38 }
  0x1e   : >> { %s686_s10 = scalar_select %p685_p10, 255, 0 }
  0x20   : >> { %v687_v9 = vld [vmem:[%s325_s9] sm:%s686_s10]   ;;  %v690_v10 = vld [vmem:[%s325_s9 + $0x8] sm:%s686_s10]  }
  0x21   : >> { %v377_v44 = vmul.f32 %v687_v9, %v376_v26  ;;  %v399_v45 = vmul.f32 %v687_v9, %v398_v34  ;;  %v378_v47 = vmul.f32 %v690_v10, %v376_v26  ;;  %v400_v48 = vmul.f32 %v690_v10, %v398_v34 }
  0x22   : >> { %v356_v49 = vmul.f32 %v690_v10, %v354_v37  ;;  %v355_v51 = vmul.f32 %v687_v9, %v354_v37 }
  0x23   : >> { %v379_v52 = vadd.f32 %v377_v44, %v371_v40  ;;  %v401_v53 = vadd.f32 %v399_v45, %v393_v41  ;;  %v380_v54 = vadd.f32 %v378_v47, %v372_v42  ;;  %v402_v55 = vadd.f32 %v400_v48, %v394_v43 }
  0x24   : >> { %v358_v58 = vadd.f32 %v356_v49, %v350_v46  ;;  %v357_v61 = vadd.f32 %v355_v51, %v349_v50 }
  0x25   : >> { %v403_v56 = vrot.slane %v379_v52, 7  ;;  %v412_v57 = vrot.slane %v401_v53, 1  ;;  %v404_v59 = vrot.slane %v380_v54, 7  ;;  %v413_v60 = vrot.slane %v402_v55, 1 }
  0x27   : >> { %v407_v62 = vsel %vm405_vm2, %v404_v59, %v403_v56  ;;  %v406_v63 = vsel %vm405_vm2, %v403_v56, %v404_v59  ;;  %v416_v2 = vsel %vm414_vm3, %v413_v60, %v412_v57  ;;  %v415_v13 = vsel %vm414_vm3, %v412_v57, %v413_v60 }
  0x28   : >> { %v408_v6 = vmul.f32 %v828_v8, %v407_v62  ;;  %v411_v7 = vadd.f32 %v406_v63, %v358_v58  ;;  %v418_v12 = vmul.f32 %v832_v11, %v416_v2 }
  0x2a   : >> { %v410_v16 = vadd.f32 %v408_v6, %v357_v61  ;;  %v420_v17 = vadd.f32 %v418_v12, %v411_v7  ;;  %v919_v12 = vmov %v917_v14 }
  0x2c   : >> { %v419_v18 = vadd.f32 %v415_v13, %v410_v16  ;;  %v428_v19 = vadd.f32 %v812_v4, %v420_v17  ;;  %v920_v13 = vmov %v918_v15  ;;  %312 = sbr.rel (!%p310_p11) target bundleno = 20 (0x14), region = 79 }
  0x2e   : >> { %v427_v20 = vadd.f32 %v812_v4, %v419_v18  ;;  %433 = vst.msk [vmem:[%s430_s12 + $0x8] sm:$0xff] %vm431_vm4, %v428_v19 }
  0x30   : >> { %432 = vst.msk [vmem:[%s430_s12] sm:$0xff] %vm431_vm4, %v427_v20 }
  0x31 PF: > { %s13_s14 = sadd.s32 1, %s733_s14   ;;  %s922_s12 = smov %s729_s13 }
  0x32   : > { %p10_p12 = scmp.ge.s32.totalorder %s13_s14, 4   ;;  %s923_s13 = smov %s925_s15 }
  0x34   :  { %12 = sbr.rel (!%p10_p12) target bundleno = 2 (0x2), region = 90 }

</bundles_post_ra>
